<compile_context>
chip_gen: v6e
topology: v6e:2x2x1
jax: 0.10.0
libtpu: 0.0.40
codegen_flags: <defaults>
</compile_context>

<pallas_src>
import functools

import jax
import jax.numpy as jnp
from jax.experimental import pallas as pl
from jax.experimental.pallas import tpu as pltpu


def spatial_input_kernel(edge_ref, emb_t_ref, wcrt_t_ref, bcrt_ref,
                         wdist_t_ref, bdist_ref, out_ref, *, num_emb):
  """Feature-major tile: edge_ref [1+F, TE] -> out_ref [H, TE]."""
  ef = edge_ref[...]                                       # [1+F, TE] f32
  te = ef.shape[1]

  # --- distance -> embedding index ----------------------------------------
  # Reference: clip(d, 1.0, cut_dist - 1e-6).long() - 1.  Clamp in float
  # first (so the f32->i32 cast can never overflow for huge inputs), then
  # clamp the integer index too (robust when cut_dist swallows the 1e-6).
  dist_f = jnp.clip(ef[0:1, :], 1.0, float(num_emb + 1))   # [1, TE]
  dist = jnp.minimum(dist_f.astype(jnp.int32) - 1, num_emb - 1)

  # One-hot (transposed): [num_emb, TE]; bf16 so the gather dot is MXU-native.
  ids = jax.lax.broadcasted_iota(jnp.int32, (num_emb, te), 0)
  onehot = (ids == dist).astype(jnp.bfloat16)

  # --- embedding gather on the MXU: [H, num_emb] @ [num_emb, TE] -----------
  eh = jnp.dot(emb_t_ref[...], onehot,
               preferred_element_type=jnp.float32)         # [H, TE] f32

  # --- crt DenseLayer(relu): [H, F] @ [F, TE] + b ---------------------------
  ec = jnp.dot(wcrt_t_ref[...], ef[1:, :].astype(jnp.bfloat16),
               preferred_element_type=jnp.float32) + bcrt_ref[...]
  ec = jnp.maximum(ec, 0.0)
  # NOTE: leaky_relu(0.2) applied right after relu in the original module is
  # a mathematical identity on non-negative values, so it is omitted.

  # --- softmax over the hidden dim (sublane axis in this layout) -----------
  ec = jnp.exp(ec - jnp.max(ec, axis=0, keepdims=True))
  denom = jnp.sum(ec, axis=0, keepdims=True)
  ec = ec * pl.reciprocal(denom, approx=True)              # EUP reciprocal

  # --- dist_input_layer: relu(W_dist^T @ concat([eh, ec], 0) + b) ----------
  # Single K=2H dot; the sublane concat at offset H is tile-aligned (cheap).
  cat = jnp.concatenate([eh, ec], axis=0).astype(jnp.bfloat16)   # [2H, TE]
  out = jnp.dot(wdist_t_ref[...], cat,
                preferred_element_type=jnp.float32) + bdist_ref[...]
  out_ref[...] = jnp.maximum(out, 0.0)


def spatial_input_layer(edge_feat, params, *, cut_dist, tile_e=2048):
  """edge_feat: [E, 1 + num_flt] float32 -> [E, hidden_dim] float32."""
  emb, w_crt, b_crt, w_dist, b_dist = (
      params["emb"], params["w_crt"], params["b_crt"],
      params["w_dist"], params["b_dist"])
  num_emb, hidden = emb.shape
  num_flt = w_crt.shape[0]
  e = edge_feat.shape[0]
  assert num_emb == int(cut_dist) - 1

  # Weights pre-transposed (and cast to bf16 for MXU-native dots).  Biases
  # stay f32 column vectors, added after the f32 accumulation.
  emb_t = emb.T.astype(jnp.bfloat16)                       # [H, num_emb]
  wcrt_t = w_crt.T.astype(jnp.bfloat16)                    # [H, F]
  wdist_t = w_dist.T.astype(jnp.bfloat16)                  # [H, 2H]
  bcrt_t = b_crt.reshape(1, hidden).T.astype(jnp.float32)  # [H, 1]
  bdist_t = b_dist.reshape(1, hidden).T.astype(jnp.float32)

  # Feature-major input: edges on the lane axis.
  edge_t = edge_feat.astype(jnp.float32).T                 # [1+F, E]

  # --- tile the (lane) edge dimension ---------------------------------------
  round_up = lambda n, m: ((n + m - 1) // m) * m
  e128 = round_up(max(e, 1), 128)
  tile_e = round_up(max(128, min(tile_e, 4096)), 128)      # v7x VMEM-safe cap
  tile_e = min(tile_e, e128)
  if e128 >= 2 * 128 and tile_e == e128:
    # >= 2 grid steps so the "parallel" axis can feed both v7x TensorCores.
    tile_e = round_up(e128 // 2, 128)
  n_tiles = pl.cdiv(e128, tile_e)
  e_pad = n_tiles * tile_e
  if e_pad != e:
    # Padded columns get dist=0 -> clipped to embedding row 0; sliced off.
    edge_t = jnp.pad(edge_t, ((0, 0), (0, e_pad - e)))

  kernel = functools.partial(spatial_input_kernel, num_emb=num_emb)
  const = lambda i: (0, 0)
  out_t = pl.pallas_call(
      kernel,
      out_shape=jax.ShapeDtypeStruct((hidden, e_pad), jnp.float32),
      grid=(n_tiles,),
      in_specs=[
          pl.BlockSpec((1 + num_flt, tile_e), lambda i: (0, i)),
          pl.BlockSpec((hidden, num_emb), const),
          pl.BlockSpec((hidden, num_flt), const),
          pl.BlockSpec((hidden, 1), const),
          pl.BlockSpec((hidden, 2 * hidden), const),
          pl.BlockSpec((hidden, 1), const),
      ],
      out_specs=pl.BlockSpec((hidden, tile_e), lambda i: (0, i)),
      compiler_params=pltpu.CompilerParams(
          dimension_semantics=("parallel",),
          vmem_limit_bytes=32 * 1024 * 1024),
  )(edge_t, emb_t, wcrt_t, bcrt_t, wdist_t, bdist_t)

  out_t = out_t[:, :e] if e_pad != e else out_t
  return out_t.T                                           # [E, H]


def init_params(key, hidden_dim, cut_dist, num_flt):
  k = jax.random.split(key, 5)
  num_emb = int(cut_dist) - 1
  return {
      "emb":    jax.random.normal(k[0], (num_emb, hidden_dim), jnp.float32) * 0.1,
      "w_crt":  jax.random.normal(k[1], (num_flt, hidden_dim), jnp.float32) * 0.2,
      "b_crt":  jax.random.normal(k[2], (1, hidden_dim), jnp.float32) * 0.05,
      "w_dist": jax.random.normal(k[3], (2 * hidden_dim, hidden_dim), jnp.float32) * 0.2,
      "b_dist": jax.random.normal(k[4], (1, hidden_dim), jnp.float32) * 0.05,
  }


def reference_forward(edge_feat, params, *, cut_dist):
  """Pure-JAX f32 reference mirroring the PyTorch forward, for validation."""
  dist = jnp.clip(edge_feat[:, 0], 1.0, cut_dist - 1e-6).astype(jnp.int32) - 1
  eh_emb = params["emb"][dist]
  ec = edge_feat[:, 1:] @ params["w_crt"] + params["b_crt"]
  ec = jax.nn.relu(ec)
  ec = jax.nn.leaky_relu(ec, 0.2)
  ec = jax.nn.softmax(ec, axis=1)
  cat = jnp.concatenate([eh_emb, ec], axis=1)
  return jax.nn.relu(cat @ params["w_dist"] + params["b_dist"])


if __name__ == "__main__":
  hidden_dim = 32
  cut_dist = 5
  num_flt = 4
  E = 200          # small, but exercises a 2-step grid with lane padding

  key = jax.random.PRNGKey(0)
  k_param, k_dist, k_feat = jax.random.split(key, 3)

  params = init_params(k_param, hidden_dim, cut_dist, num_flt)

  # Column 0: distances in roughly [0.5, cut_dist + 1] (exercises both clip
  # ends); remaining columns: correlation features.
  dist_col = jax.random.uniform(k_dist, (E, 1), jnp.float32,
                                minval=0.5, maxval=cut_dist + 1.0)
  crt_cols = jax.random.normal(k_feat, (E, num_flt), jnp.float32)
  edge_feat = jnp.concatenate([dist_col, crt_cols], axis=1)   # [E, 1 + num_flt]

  out = spatial_input_layer(edge_feat, params, cut_dist=cut_dist)
  out = jax.block_until_ready(out)

  ref = reference_forward(edge_feat, params, cut_dist=float(cut_dist))
  assert out.shape == (E, hidden_dim)
  # Tolerance accounts for bf16 matmul operands (f32 accumulation) and the
  # hardware approximate reciprocal in the softmax normalization; real bugs
  # (wrong row / wrong weight / wrong layout) produce O(0.1-1) errors.
  assert jnp.allclose(out, ref, atol=3e-2, rtol=3e-2), (
      float(jnp.max(jnp.abs(out - ref))))

  print("KERNEL_OK")
</pallas_src>

<mosaic_0001>
module attributes {stable_mosaic.version = 11 : i64} {
  func.func @spatial_input_kernel(%arg0: i32, %arg1: memref<5x128xf32, #tpu.memory_space<vmem>>, %arg2: memref<32x4xbf16, #tpu.memory_space<vmem>>, %arg3: memref<32x4xbf16, #tpu.memory_space<vmem>>, %arg4: memref<32x1xf32, #tpu.memory_space<vmem>>, %arg5: memref<32x64xbf16, #tpu.memory_space<vmem>>, %arg6: memref<32x1xf32, #tpu.memory_space<vmem>>, %arg7: memref<32x128xf32, #tpu.memory_space<vmem>>) attributes {dimension_semantics = [#tpu.dimension_semantics<parallel>], iteration_bounds = array<i64: 2>, scalar_prefetch = 0 : i64, scratch_operands = 0 : i64, tpu.core_type = #tpu.core_type<tc>, window_params = [{transform_indices = @transform_0, window_bounds = array<i64: 5, 128>}, {pipeline_mode = #tpu.pipeline_mode<synchronous>, transform_indices = @transform_1, window_bounds = array<i64: 32, 4>}, {pipeline_mode = #tpu.pipeline_mode<synchronous>, transform_indices = @transform_2, window_bounds = array<i64: 32, 4>}, {pipeline_mode = #tpu.pipeline_mode<synchronous>, transform_indices = @transform_3, window_bounds = array<i64: 32, 1>}, {pipeline_mode = #tpu.pipeline_mode<synchronous>, transform_indices = @transform_4, window_bounds = array<i64: 32, 64>}, {pipeline_mode = #tpu.pipeline_mode<synchronous>, transform_indices = @transform_5, window_bounds = array<i64: 32, 1>}, {transform_indices = @transform_6, window_bounds = array<i64: 32, 128>}]} {
    %c0 = arith.constant 0 : index
    %c0_0 = arith.constant 0 : index
    %0 = vector.load %arg1[%c0, %c0_0] : memref<5x128xf32, #tpu.memory_space<vmem>>, vector<5x128xf32>
    %1 = vector.extract_strided_slice %0 {offsets = [0, 0], sizes = [1, 128], strides = [1, 1]} : vector<5x128xf32> to vector<1x128xf32>
    %cst = arith.constant 1.000000e+00 : f32
    %cst_1 = arith.constant 5.000000e+00 : f32
    %2 = vector.broadcast %cst : f32 to vector<1x128xf32>
    %3 = arith.maximumf %2, %1 : vector<1x128xf32>
    %4 = vector.broadcast %cst_1 : f32 to vector<1x128xf32>
    %5 = arith.minimumf %4, %3 : vector<1x128xf32>
    %6 = arith.fptosi %5 : vector<1x128xf32> to vector<1x128xi32>
    %c1_i32 = arith.constant 1 : i32
    %7 = vector.broadcast %c1_i32 : i32 to vector<1x128xi32>
    %8 = arith.subi %6, %7 : vector<1x128xi32>
    %c3_i32 = arith.constant 3 : i32
    %9 = vector.broadcast %c3_i32 : i32 to vector<1x128xi32>
    %10 = arith.minsi %8, %9 : vector<1x128xi32>
    %11 = tpu.iota {dimensions = array<i32: 0>} : vector<4x128xi32>
    %12 = vector.broadcast %10 : vector<1x128xi32> to vector<4x128xi32>
    %13 = arith.cmpi eq, %11, %12 : vector<4x128xi32>
    %14 = arith.extui %13 : vector<4x128xi1> to vector<4x128xi32>
    %15 = arith.sitofp %14 : vector<4x128xi32> to vector<4x128xf32>
    %16 = arith.truncf %15 : vector<4x128xf32> to vector<4x128xbf16>
    %c0_2 = arith.constant 0 : index
    %c0_3 = arith.constant 0 : index
    %17 = vector.load %arg2[%c0_2, %c0_3] : memref<32x4xbf16, #tpu.memory_space<vmem>>, vector<32x4xbf16>
    %cst_4 = arith.constant dense<0.000000e+00> : vector<32x128xf32>
    %18 = tpu.matmul %17, %16, %cst_4 {dimension_numbers = #tpu.dot_dimension_numbers<[1], [0], [0], [1], [0, 0, 1, 1], [], []>} : vector<32x4xbf16>, vector<4x128xbf16>, vector<32x128xf32> -> vector<32x128xf32>
    %c0_5 = arith.constant 0 : index
    %c0_6 = arith.constant 0 : index
    %19 = vector.load %arg3[%c0_5, %c0_6] : memref<32x4xbf16, #tpu.memory_space<vmem>>, vector<32x4xbf16>
    %20 = vector.extract_strided_slice %0 {offsets = [1, 0], sizes = [4, 128], strides = [1, 1]} : vector<5x128xf32> to vector<4x128xf32>
    %21 = arith.truncf %20 : vector<4x128xf32> to vector<4x128xbf16>
    %cst_7 = arith.constant dense<0.000000e+00> : vector<32x128xf32>
    %22 = tpu.matmul %19, %21, %cst_7 {dimension_numbers = #tpu.dot_dimension_numbers<[1], [0], [0], [1], [0, 0, 1, 1], [], []>} : vector<32x4xbf16>, vector<4x128xbf16>, vector<32x128xf32> -> vector<32x128xf32>
    %c0_8 = arith.constant 0 : index
    %c0_9 = arith.constant 0 : index
    %23 = vector.load %arg4[%c0_8, %c0_9] : memref<32x1xf32, #tpu.memory_space<vmem>>, vector<32x1xf32>
    %24 = vector.broadcast %23 : vector<32x1xf32> to vector<32x128xf32>
    %25 = arith.addf %22, %24 : vector<32x128xf32>
    %cst_10 = arith.constant 0.000000e+00 : f32
    %26 = vector.broadcast %cst_10 : f32 to vector<32x128xf32>
    %27 = arith.maximumf %25, %26 : vector<32x128xf32>
    %cst_11 = arith.constant dense<0xFF800000> : vector<128xf32>
    %28 = vector.multi_reduction <maximumf>, %27, %cst_11 [0] : vector<32x128xf32> to vector<128xf32>
    %29 = vector.shape_cast %28 : vector<128xf32> to vector<1x128xf32>
    %30 = vector.broadcast %29 : vector<1x128xf32> to vector<32x128xf32>
    %31 = arith.subf %27, %30 : vector<32x128xf32>
    %32 = math.exp %31 : vector<32x128xf32>
    %cst_12 = arith.constant dense<0.000000e+00> : vector<128xf32>
    %33 = vector.multi_reduction <add>, %32, %cst_12 [0] : vector<32x128xf32> to vector<128xf32>
    %34 = vector.shape_cast %33 : vector<128xf32> to vector<1x128xf32>
    %35 = tpu.reciprocal %34 {approx = true} : vector<1x128xf32> -> vector<1x128xf32>
    %36 = vector.broadcast %35 : vector<1x128xf32> to vector<32x128xf32>
    %37 = arith.mulf %32, %36 : vector<32x128xf32>
    %38 = tpu.concatenate %18, %37 in 0 : vector<32x128xf32>, vector<32x128xf32> -> vector<64x128xf32>
    %39 = arith.truncf %38 : vector<64x128xf32> to vector<64x128xbf16>
    %c0_13 = arith.constant 0 : index
    %c0_14 = arith.constant 0 : index
    %40 = vector.load %arg5[%c0_13, %c0_14] : memref<32x64xbf16, #tpu.memory_space<vmem>>, vector<32x64xbf16>
    %cst_15 = arith.constant dense<0.000000e+00> : vector<32x128xf32>
    %41 = tpu.matmul %40, %39, %cst_15 {dimension_numbers = #tpu.dot_dimension_numbers<[1], [0], [0], [1], [0, 0, 1, 1], [], []>} : vector<32x64xbf16>, vector<64x128xbf16>, vector<32x128xf32> -> vector<32x128xf32>
    %c0_16 = arith.constant 0 : index
    %c0_17 = arith.constant 0 : index
    %42 = vector.load %arg6[%c0_16, %c0_17] : memref<32x1xf32, #tpu.memory_space<vmem>>, vector<32x1xf32>
    %43 = vector.broadcast %42 : vector<32x1xf32> to vector<32x128xf32>
    %44 = arith.addf %41, %43 : vector<32x128xf32>
    %cst_18 = arith.constant 0.000000e+00 : f32
    %45 = vector.broadcast %cst_18 : f32 to vector<32x128xf32>
    %46 = arith.maximumf %44, %45 : vector<32x128xf32>
    %c0_19 = arith.constant 0 : index
    %c0_20 = arith.constant 0 : index
    %47 = vector.load %arg7[%c0_19, %c0_20] : memref<32x128xf32, #tpu.memory_space<vmem>>, vector<32x128xf32>
    tpu.vector_store %arg7[%c0_19, %c0_20], %46 {strides = array<i32>} : memref<32x128xf32, #tpu.memory_space<vmem>>, vector<32x128xf32>,
    return
  }
  func.func @transform_0(%arg0: i32) -> (i32, i32) {
    %c0_i32 = arith.constant 0 : i32
    %c0_i32_0 = arith.constant 0 : i32
    return %c0_i32, %arg0 : i32, i32
  }
  func.func @transform_1(%arg0: i32) -> (i32, i32) {
    %c0_i32 = arith.constant 0 : i32
    %c0_i32_0 = arith.constant 0 : i32
    %c0_i32_1 = arith.constant 0 : i32
    return %c0_i32, %c0_i32_0 : i32, i32
  }
  func.func @transform_2(%arg0: i32) -> (i32, i32) {
    %c0_i32 = arith.constant 0 : i32
    %c0_i32_0 = arith.constant 0 : i32
    %c0_i32_1 = arith.constant 0 : i32
    return %c0_i32, %c0_i32_0 : i32, i32
  }
  func.func @transform_3(%arg0: i32) -> (i32, i32) {
    %c0_i32 = arith.constant 0 : i32
    %c0_i32_0 = arith.constant 0 : i32
    %c0_i32_1 = arith.constant 0 : i32
    return %c0_i32, %c0_i32_0 : i32, i32
  }
  func.func @transform_4(%arg0: i32) -> (i32, i32) {
    %c0_i32 = arith.constant 0 : i32
    %c0_i32_0 = arith.constant 0 : i32
    %c0_i32_1 = arith.constant 0 : i32
    return %c0_i32, %c0_i32_0 : i32, i32
  }
  func.func @transform_5(%arg0: i32) -> (i32, i32) {
    %c0_i32 = arith.constant 0 : i32
    %c0_i32_0 = arith.constant 0 : i32
    %c0_i32_1 = arith.constant 0 : i32
    return %c0_i32, %c0_i32_0 : i32, i32
  }
  func.func @transform_6(%arg0: i32) -> (i32, i32) {
    %c0_i32 = arith.constant 0 : i32
    %c0_i32_0 = arith.constant 0 : i32
    return %c0_i32, %arg0 : i32, i32
  }
}

</mosaic_0001>

<bundles_post_ra>
// kernel: tpu_custom_call.1
= control target key start
LH: loop header
LB: loop body
LE: loop exit
PB: predicated region body
PF: predicated region fallthrough
CT: control target
= control target key end

     0   :  { %11 = vsyncpa [#allocation3], 0  ;;  %s1050_s0 = inlined_call_operand.vmem [shape: f32[5,256], index: 0, kind: input, shape index: {}]   ;;  %s1051_s1 = inlined_call_operand.vmem [shape: bf16[32,4], index: 1, kind: input, shape index: {}]   ;;  %s1052_s2 = inlined_call_operand.vmem [shape: bf16[32,4], index: 2, kind: input, shape index: {}]   ;;  %s1053_s3 = inlined_call_operand.vmem [shape: f32[32,1], index: 3, kind: input, shape index: {}]   ;;  %s1054_s4 = inlined_call_operand.vmem [shape: bf16[32,64], index: 4, kind: input, shape index: {}]   ;;  %s1055_s5 = inlined_call_operand.vmem [shape: f32[32,1], index: 5, kind: input, shape index: {}]   ;;  %s1056_s6 = inlined_call_operand.hbm [shape: f32[32,256], index: 6, kind: output, shape index: {}]  }
   0x1   :  { %13 = vsyncpa [#allocation3 + $0x1], 0  ;;  %s892_s21 = smov 0   ;;  %s894_s22 = smov 0  }
   0x2   :  { %s896_s23 = smov 0   ;;  %s898_s24 = smov 0  }
   0x3 LB: > { %s913_s25 = sadd.s32 4294967295, %s849_s24   ;;  %s663_s26 = sadd.s32 4294967294, %s849_s24   ;;  %s849_s24 = sphi %s898_s24, %s1062_s24   ;;  %s845_s23 = sphi %s896_s23, %s1061_s23   ;;  %s841_s22 = sphi %s894_s22, %s1060_s22   ;;  %s837_s21 = sphi %s892_s21, %s1059_s21  }
   0x4   : > { %s917_s27 = sadd.s32 1, %s849_s24   ;;  %s157_s28 = sadd.s32 1, %s845_s23 }
   0x5   : > { %s154_s29 = ssub.s32 %s849_s24, %s917_s27  ;;  %p167_p0 = scmp.ne.s32.totalorder %s845_s23, %s841_s22 }
   0x6   : > { %p155_p1 = scmp.eq.s32.totalorder %s154_s29, 0  ;;  %p168_p2 = scmp.eq.s32.totalorder %s913_s25, 1 }
   0x7   : > { %p173_p3 = scmp.ne.s32.totalorder %s841_s22, %s837_s21  ;;  %p174_p4 = scmp.eq.s32.totalorder %s663_s26, 1 }
   0x8   : > { %s928_s30 = scalar_select %p155_p1, %s845_s23, %s157_s28  }
   0x9   : > { %p930_p5 = por %p168_p2, %p167_p0  ;;  %p934_p6 = por %p174_p4, %p173_p3 }
   0xa   : > { %p666_p7 = scmp.ge.s32.totalorder %s849_s24, 1  ;;  %p214_p8 = scmp.lt.s32.totalorder %s849_s24, 3 }
   0xc   : > { %p215_p9 = pnand %p666_p7, %p214_p8 }
   0xd   : > { %p243_p10 = scmp.lt.s32.totalorder (!%p215_p9), %s913_s25, 1  ;;  %s684_s16 = sshll.u32 (!%p215_p9), %s913_s25, 7 }
   0xe   : > { %218 = sbr.rel (%p215_p9) target bundleno = 562 (0x232), region = 44  ;;  %s1008_s19 = scalar_lea.hbm (!%p215_p9), %s1056_s6, %s684_s16 }
   0xf   : > { %s853_s26 = smov (!%p215_p9), [#allocation2]  }
  0x10   : > { %s793_s28 = sshll.u32 (!%p215_p9), %s853_s26, 4  ;;  %s794_s28 = int_to_ptr.vmem [resolvable:$false] %s793_s28 }
  0x11   : > { %s795_s29 = scalar_lea.vmem (!%p215_p9), %s794_s28, 1024 }
  0x13   : > { %v773_v0 = vld [vmem:[%s1051_s1] sm:$0xff]   ;;  %vm279_vm0 = vcmask 31744   ;;  %s244_s11 = scalar_select %p243_p10, %s913_s25, 1  ;;  %v851_v1 = vmov 0   ;;  %v346_v2 = vld [vmem:[%s1053_s3 + $0x10] sm:$0xff]  ;;  %v347_v5 = vld [vmem:[%s1053_s3 + $0x18] sm:$0xff]  ;;  %v255_v7 = vlaneseq }
  0x14   : > { %701 = vmatprep.mubr.msk.bf16.mxu1 %vm279_vm0, %v773_v0  ;;  %772 = vset.pattern.permute.xlu1 %v851_v1  ;;  %v344_v3 = vld [vmem:[%s1053_s3] sm:$0xff]  ;;  %v345_v8 = vld [vmem:[%s1053_s3 + $0x8] sm:$0xff]  ;;  %v493_v16 = vld [vmem:[%s1055_s5 + $0x18] sm:$0xff]  ;;  %v852_v25 = vmov 0.0   ;;  %vm286_vm3 = vcmask 1041408   ;;  %vm524_vm4 = vcmask 523264  }
  0x15   : > { %s668_s12 = sshll.u32 %s244_s11, 3  ;;  %771 = vset.pattern.permute.xlu0 %v851_v1  ;;  %360 = vperm.xlu1 %772, %v346_v2   ;;  %v491_v10 = vld [vmem:[%s1055_s5 + $0x8] sm:$0xff]  ;;  %v256_v12 = vshrl.u32 %v255_v7, 7  ;;  %v490_v14 = vld [vmem:[%s1055_s5] sm:$0xff]  ;;  %v492_v20 = vld [vmem:[%s1055_s5 + $0x10] sm:$0xff] }
  0x16   : > { %s246_s17 = scalar_lea.vmem %s1050_s0, %s668_s12  ;;  %350 = vperm.xlu0 %771, %v344_v3   ;;  %v774_v30 = vld [vmem:[%s1051_s1 + $0x8] sm:$0xff]   ;;  %v775_v31 = vld [vmem:[%s1052_s2] sm:$0xff]   ;;  %s240_s12 = sand.u32 1, %s841_s22  }
  0x17   : > { %v248_v4 = vld [vmem:[%s246_s17] sm:$0x1f]  ;;  %v259_v18 = vsub.s32 0, %v256_v12  ;;  %v776_v33 = vld [vmem:[%s1052_s2 + $0x8] sm:$0xff]   ;;  %s667_s13 = sshll.u32 %s240_s12, 5  ;;  %s1010_s20 = scalar_lea.sflag [#allocation3], %s240_s12 }
  0x18   : > { %v249_v6 = vmax.f32 %v248_v4, 1.0  ;;  %v343_v13 = vpack.c.bf16 %v248_v4, %v248_v4  ;;  %v777_v34 = vld [vmem:[%s1054_s4] sm:$0xff]   ;;  %s242_s14 = scalar_lea.vmem [#allocation2], %s667_s13 }
  0x19   : > { %365 = vperm.xlu1 %772, %v347_v5   ;;  %719 = vmatprep.mubr.msk.bf16.mxu0 %vm524_vm4, %v777_v34  ;;  %s601_s15 = sshll.u32 %s242_s14, 4  ;;  %s1003_s15 = int_to_ptr.vmem [resolvable:$true] %s601_s15 }
  0x1a   : > { %v250_v9 = vmin.f32 %v249_v6, 5.0  ;;  %355 = vperm.xlu0 %771, %v345_v8   ;;  %v381_v19 = vshll.u32 %v343_v13, 16  ;;  %v379_v23 = vshrl.u32 %v343_v13, 16  ;;  %s789_s25 = scalar_lea.vmem %s1003_s15, 512  ;;  %p796_p0 = scmp.lt.s32.totalorder %s1003_s15, %s794_s28 }
  0x1b   : > { %p790_p11 = scmp.ne.s32.totalorder %s1003_s15, %s789_s25  ;;  %p797_p1 = scmp.lt.s32.totalorder %s795_s29, %s789_s25 }
  0x1c   : > { %v725_v11 = vtrunc.f32 %v250_v9  ;;  %v383_v24 = vrot.slane %v381_v19, 1 }
  0x1d   : > { %501 = vperm.xlu1 %772, %v491_v10   ;;  %p791_p12 = pnand %p790_p11, %p930_p5  ;;  %p798_p2 = por %p797_p1, %p796_p0 }
  0x1e   : > { %v726_v15 = vcvt.f32.s32 %v725_v11  ;;  %496 = vperm.xlu0 %771, %v490_v14   ;;  %v384_v28 = vor.u32 %v383_v24, %v379_v23 }
  0x1f   : > { %p792_p13 = pneg %p791_p12 }
  0x20   : > { %v669_v17 = vadd.s32 4294967295, %v726_v15  ;;  %v392_v32 = vsel %vm286_vm3, %v384_v28, 0 }
  0x21   : > { %511 = vperm.xlu1 %772, %v493_v16   ;;  %p799_p3 = pnand %p798_p2, %p792_p13 }
  0x22   : > { %vm253_vm1 = vcmp.lt.s32.totalorder %v669_v17, 3  ;;  %506 = vperm.xlu0 %771, %v492_v20  }
  0x23   : > { %v254_v21 = vsel %vm253_vm1, %v669_v17, 3 }
  0x24   : > { %v260_v22 = vrot.slane %v254_v21, %v259_v18 }
  0x26   : > { %vm261_vm2 = vcmp.eq.s32.totalorder %v256_v12, %v260_v22 }
  0x27   : > { %v670_v26 = vsel %vm261_vm2, 1.0, %v852_v25 }
  0x28   : > { %v264_v27 = vpack.c.bf16 %v670_v26, %v670_v26 }
  0x2a   : > { %723 = vmatprep.subr.msk.bf16.mxu1 %vm286_vm3, %v264_v27  ;;  %v288_v29 = vsel %vm286_vm3, %v264_v27, 0 }
  0x2b   : > { %700 = vmatpush3.bf16.msra.mxu1 %v288_v29 }
  0x2c   : > { %724 = vmatprep.subr.msk.bf16.mxu1 %vm286_vm3, %v384_v28 }
  0x2e   : > { %702 = vmatmul.mubr.msk.bf16.vlgmr.msra.gmra.mxu1 %vm279_vm0, %v774_v30  ;;  %v778_v30 = vld [vmem:[%s1054_s4 + $0x8] sm:$0xff]  }
  0x2f   : > { %706 = vmatpush3.bf16.msra.mxu1 %v392_v32  ;;  %707 = vmatprep.mubr.msk.bf16.mxu1 %vm279_vm0, %v775_v31 }
  0x36   : > { %708 = vmatmul.mubr.msk.bf16.vlgmr.msra.gmra.mxu1 %vm279_vm0, %v776_v33 }
  0x90   : > { %v361_v39 = vpop.permute.xlu1 %360 }
  0x91   : > { %v351_v42 = vpop.permute.xlu0 %350 }
  0x94   : > { %v366_v45 = vpop.permute.xlu1 %365 }
  0x95   : > { %v356_v50 = vpop.permute.xlu0 %355 }
  0x98   : > { %v502_v32 = vpop.permute.xlu1 %501 }
  0x99   : > { %v497_v31 = vpop.permute.xlu0 %496 }
  0x9d   : > { %v507_v33 = vpop.permute.xlu0 %506 }
  0xee   : > { %v703_v35 = vpop.f32.mrf.mxu1 }
  0xf0   : > { %v324_v36 = vpop.f32.mrf.mxu1 }
  0xf2   : > { %v704_v37 = vpop.f32.mrf.mxu1 }
  0xf3   : > { %v989_v38 = vpack.c.bf16 %v704_v37, %v703_v35 }
  0xf4   : > { %v327_v40 = vpop.f32.mrf.mxu1 }
  0xf5   : > { %v991_v41 = vpack.c.bf16 %v327_v40, %v324_v36 }
  0xf6   : > { %v709_v43 = vpop.f32.mrf.mxu1 }
  0xf7   : > { %v437_v47 = vadd.f32 %v709_v43, %v361_v39  ;;  %v512_v39 = vpop.permute.xlu1 %511 }
  0xf8   : > { %v428_v44 = vpop.f32.mrf.mxu1 }
  0xf9   : > { %v429_v48 = vadd.f32 %v428_v44, %v351_v42  ;;  %v445_v54 = vmax.f32 %v437_v47, 0.0 }
  0xfa   : > { %v710_v46 = vpop.f32.mrf.mxu1 }
  0xfb   : > { %v440_v49 = vadd.f32 %v710_v46, %v366_v45  ;;  %v443_v55 = vmax.f32 %v429_v48, 0.0 }
  0xfc   : > { %v431_v51 = vpop.f32.mrf.mxu1 }
  0xfd   : > { %v446_v52 = vmax.f32 %v440_v49, 0.0  ;;  %v432_v53 = vadd.f32 %v431_v51, %v356_v50 }
  0xff   : > { %v444_v56 = vmax.f32 %v432_v53, 0.0  ;;  %v448_v57 = vmax.f32 %v445_v54, %v446_v52 }
 0x101   : > { %v447_v58 = vmax.f32 %v443_v55, %v444_v56 }
 0x103   : > { %v449_v59 = vmax.f32 %v447_v58, %v448_v57 }
 0x105   : > { %v450_v60 = vrot.slane %v449_v59, 4 }
 0x107   : > { %v451_v61 = vmax.f32 %v449_v59, %v450_v60 }
 0x109   : > { %v452_v62 = vrot.slane %v451_v61, 2 }
 0x10b   : > { %v453_v63 = vmax.f32 %v451_v61, %v452_v62 }
 0x10d   : > { %v454_v0 = vrot.slane %v453_v63, 1 }
 0x10f   : > { %v455_v1 = vmax.f32 %v453_v63, %v454_v0 }
 0x111   : > { %v456_v2 = vsub.f32 %v443_v55, %v455_v1  ;;  %v457_v3 = vsub.f32 %v444_v56, %v455_v1  ;;  %v458_v4 = vsub.f32 %v445_v54, %v455_v1  ;;  %v459_v5 = vsub.f32 %v446_v52, %v455_v1 }
 0x113   : > { %v460_v6 = vmul.f32 1.442695, %v456_v2  ;;  %v462_v7 = vmul.f32 1.442695, %v457_v3  ;;  %v464_v8 = vmul.f32 1.442695, %v458_v4 }
 0x114   : > { %v466_v9 = vmul.f32 1.442695, %v459_v5 }
 0x115   : > { %779 = vpow2.f32 %v460_v6 }
 0x116   : > { %781 = vpow2.f32 %v462_v7 }
 0x117   : > { %783 = vpow2.f32 %v464_v8 }
 0x118   : > { %785 = vpow2.f32 %v466_v9 }
 0x122   : > { %v780_v10 = vpop.eup %779 }
 0x123   : > { %v782_v11 = vpop.eup %781 }
 0x124   : > { %v468_v12 = vadd.f32 %v782_v11, %v780_v10  ;;  %v784_v13 = vpop.eup %783 }
 0x125   : > { %v786_v15 = vpop.eup %785 }
 0x126   : > { %v469_v14 = vadd.f32 %v784_v13, %v468_v12 }
 0x128   : > { %v470_v16 = vadd.f32 %v786_v15, %v469_v14 }
 0x12a   : > { %v471_v17 = vrot.slane %v470_v16, 4 }
 0x12c   : > { %v472_v18 = vadd.f32 %v471_v17, %v470_v16 }
 0x12e   : > { %v473_v19 = vrot.slane %v472_v18, 2 }
 0x130   : > { %v474_v20 = vadd.f32 %v473_v19, %v472_v18 }
 0x132   : > { %v475_v21 = vrot.slane %v474_v20, 1 }
 0x134   : > { %v476_v22 = vadd.f32 %v475_v21, %v474_v20 }
 0x136   : > { %787 = vrcp.f32 %v476_v22 }
 0x143   : > { %v788_v23 = vpop.eup %787 }
 0x144   : > { %v480_v24 = vmul.f32 %v788_v23, %v784_v13  ;;  %v481_v25 = vmul.f32 %v788_v23, %v786_v15  ;;  %v478_v26 = vmul.f32 %v788_v23, %v780_v10  ;;  %v479_v27 = vmul.f32 %v788_v23, %v782_v11 }
 0x146   : > { %v485_v28 = vpack.c.bf16 %v481_v25, %v480_v24  ;;  %v484_v29 = vpack.c.bf16 %v479_v27, %v478_v26 }
 0x148   : > { %711 = vmatprep.subr.bf16.mxu0 %v485_v28 }
 0x149   : > { %712 = vmatpush3.bf16.msra.mxu0 %v485_v28 }
 0x14a   : > { %713 = vmatprep.subr.bf16.mxu0 %v484_v29 }
 0x14d   : > { %714 = vmatpush3.bf16.msra.mxu0 %v484_v29 }
 0x14e   : > { %715 = vmatprep.subr.bf16.mxu0 %v989_v38 }
 0x151   : > { %716 = vmatpush3.bf16.msra.mxu0 %v989_v38 }
 0x152   : > { %717 = vmatprep.subr.bf16.mxu0 %v991_v41 }
 0x155   : > { %718 = vmatpush3.bf16.msra.mxu0 %v991_v41 }
 0x158   : > { %720 = vmatmul.mubr.msk.bf16.vlgmr.msra.gmra.mxu0 %vm524_vm4, %v778_v30 }
 0x218   : > { %v721_v34 = vpop.f32.mrf.mxu0 }
 0x219   : > { %v574_v35 = vadd.f32 %v721_v34, %v507_v33 }
 0x21a   : > { %v565_v36 = vpop.f32.mrf.mxu0 }
 0x21b   : > { %v582_v37 = vmax.f32 %v574_v35, 0.0  ;;  %v566_v38 = vadd.f32 %v565_v36, %v497_v31 }
 0x21c   : > { %v722_v40 = vpop.f32.mrf.mxu0 }
 0x21d   : > { %586 = vst [vmem:[%s242_s14 + $0x10] sm:$0xff] %v582_v37  ;;  %v580_v41 = vmax.f32 %v566_v38, 0.0  ;;  %v577_v42 = vadd.f32 %v722_v40, %v512_v39 }
 0x21e   : > { %v568_v43 = vpop.f32.mrf.mxu0 }
 0x21f   : > { %584 = vst [vmem:[%s242_s14] sm:$0xff] %v580_v41  ;;  %v583_v44 = vmax.f32 %v577_v42, 0.0  ;;  %v569_v45 = vadd.f32 %v568_v43, %v502_v32 }
 0x221   : > { %587 = vst [vmem:[%s242_s14 + $0x18] sm:$0xff] %v583_v44  ;;  %v581_v46 = vmax.f32 %v569_v45, 0.0 }
 0x223   : > { %585 = vst [vmem:[%s242_s14 + $0x8] sm:$0xff] %v581_v46 }
 0x224   : > { %802 = shalt.err (!%p799_p3)
}
 0x225   : > { %s803_s9 = scalar_lea.hbm %s1008_s19, 512  ;;  %s807_s12 = scalar_lea.hbm %s1056_s6, 1024 }
 0x226   : > { %p804_p4 = scmp.ne.s32.totalorder %s1008_s19, %s803_s9  ;;  %p808_p9 = scmp.lt.s32.totalorder %s1008_s19, %s1056_s6 }
 0x227   : > { %p809_p10 = scmp.lt.s32.totalorder %s807_s12, %s803_s9 }
 0x228   : > { %p805_p7 = pnand %p804_p4, %p930_p5 }
 0x229   : > { %p810_p11 = por %p809_p10, %p808_p9 }
 0x22a   : > { %p806_p8 = pneg %p805_p7 }
 0x22c   : > { %p811_p12 = pnand %p810_p11, %p806_p8 }
 0x22e   : > { %814 = shalt.err (!%p811_p12)
}
 0x22f   : > { %s854_s16 = smov 128   ;;  %s855_s17 = smov 256  }
 0x230   : > { %s856_s18 = smov 8  }
 0x231   : > { %727 = dma.vmem_to_hbm [thread:$0]  (%p930_p5), %s1003_s15, 512, %s1008_s19, %s1010_s20, %s854_s16, %s855_s17, %s856_s18  }
 0x232 PF: > { %p733_p13 = scmp.ge.s32.totalorder %s849_s24, 2  ;;  %s616_s25 = sand.u32 1, %s837_s21  }
 0x233   : > { %s617_s26 = scalar_lea.sflag [#allocation3], %s616_s25 }
 0x234   : > { %p730_p0 = pnand %p733_p13, %p934_p6 }
 0x236   : > { %p731_p1 = pneg %p730_p0 }
 0x238   : > { %832 = dma.done.wait (%p731_p1), %s617_s26, 512  }
 0x239   : > { %834 = vsyncadd (%p731_p1), %s617_s26, 4294966784  ;;  %p16_p2 = scmp.ge.s32.totalorder %s917_s27, 4   ;;  %s1059_s21 = smov %s841_s22 }
 0x23a   : > { %s1060_s22 = smov %s845_s23  ;;  %s1061_s23 = smov %s928_s30 }
 0x23b   : > { %s1062_s24 = smov %s917_s27  ;;  %18 = sbr.rel (!%p16_p2) target bundleno = 3 (0x3), region = 79 }
 0x240   :  { %622 = vsyncpa [#allocation3], 1 }
 0x241   :  { %624 = vsyncpa [#allocation3 + $0x1], 1 }

</bundles_post_ra>
